<compile_context>
chip_gen: v7x
topology: tpu7x:2x2x1
jax: 0.10.0
libtpu: 0.0.40
codegen_flags: <defaults>
</compile_context>

<pallas_src>
import functools

import jax
import jax.numpy as jnp
from jax import lax
from jax.experimental import pallas as pl
from jax.experimental.pallas import tpu as pltpu

LEAKY_ALPHA = 0.2   # nn.LeakyReLU(alpha) negative slope
EPS = 1e-25         # torch.full((N,1), 1e-25) added to row sums


def _round_up(v, m):
    return -(-v // m) * m


def _leaky_relu(x, slope):
    return jnp.where(x > 0, x, slope * x)


def _elu(x):
    # F.elu / nn.ELU with alpha = 1
    return jnp.where(x > 0, x, jnp.exp(x) - 1.0)


# ----------------------- fused per-batch kernel (all heads + out_att) -----------------
def spgat_fused_kernel(x_ref, adjm_ref, mask_ref, w1_ref, w2_ref, out_ref, xcat_ref,
                       *, nheads, fp, nclass, cp):
    H, Fp, C, Cp = nheads, fp, nclass, cp
    HFp = H * Fp
    N = x_ref.shape[1]

    x = x_ref[0]                     # (N, Fin) bf16
    adj_nz = adjm_ref[0] != 0        # (N, N)   bool, from int8 structure mask
    m = mask_ref[0]                  # (N, 1)   f32

    # ---- stage 1: every head in one wide bf16 MXU matmul -----------------------------
    # w1 = [pad(W_0) | ... | pad(W_{H-1}) | 128-col score block (W_h@a_src_h, W_h@a_dst_h)]
    hs = jnp.dot(x, w1_ref[...], preferred_element_type=jnp.float32)   # (N, HFp+128) f32
    h_all_bf = hs[:, :HFp].astype(jnp.bfloat16)                        # (N, HFp)
    s_all = hs[:, HFp:HFp + 2 * H]                                     # (N, 2H) f32 scores
    sT = s_all.T                                                       # (2H, N) one XLU transpose

    for h in range(H):                                                 # static unroll (H small)
        score = s_all[:, h:h + 1] + sT[H + h:H + h + 1, :]             # (N, N) f32
        # where(): masked edges give exact 0.0 (never inf * 0 = NaN)
        e = jnp.where(adj_nz, jnp.exp(-_leaky_relu(score, LEAKY_ALPHA)), 0.0)
        rowsum = jnp.sum(e, axis=-1, keepdims=True)                    # XLU reduce (e @ 1)
        agg = jnp.dot(e.astype(jnp.bfloat16),                          # bf16 MXU, f32 acc
                      h_all_bf[:, h * Fp:(h + 1) * Fp],                # 128-aligned head slice
                      preferred_element_type=jnp.float32)              # (N, Fp)
        hp = agg * pl.reciprocal(rowsum + EPS, approx=False)
        # concat=True -> ELU; write straight into the persistent slab (padded cols stay 0)
        xcat_ref[:, h * Fp:(h + 1) * Fp] = _elu(hp)

    # ---- mask -> out_att (concat=False) -> elu -> mask -> log_softmax ----------------
    x2 = (m * xcat_ref[...]).astype(jnp.bfloat16)                      # (N, HFp)
    # w2 = [W_out padded to (HFp, Cp) | 128-col score block (W_out@a2_src, W_out@a2_dst)]
    h2s = jnp.dot(x2, w2_ref[...], preferred_element_type=jnp.float32)  # (N, Cp+128) f32
    h2_bf = h2s[:, :Cp].astype(jnp.bfloat16)
    score2 = h2s[:, Cp:Cp + 1] + h2s[:, Cp + 1:Cp + 2].T               # (N, N)
    e2 = jnp.where(adj_nz, jnp.exp(-_leaky_relu(score2, LEAKY_ALPHA)), 0.0)
    rowsum2 = jnp.sum(e2, axis=-1, keepdims=True)
    agg2 = jnp.dot(e2.astype(jnp.bfloat16), h2_bf,
                   preferred_element_type=jnp.float32)                 # (N, Cp)
    hp2 = agg2 * pl.reciprocal(rowsum2 + EPS, approx=False)

    y = m * _elu(hp2)                                                  # padded cols exactly 0
    # log_softmax over the real C class columns only (output block kept 128-lane dense)
    col = lax.broadcasted_iota(jnp.int32, (N, Cp), 1)
    valid = col < C
    y_max = jnp.max(jnp.where(valid, y, -jnp.inf), axis=-1, keepdims=True)
    z = y - y_max
    lse = jnp.log(jnp.sum(jnp.where(valid, jnp.exp(z), 0.0), axis=-1, keepdims=True))
    out_ref[0] = z - lse


# -------------------------------------- wrapper ---------------------------------------
def preprocess_adjacency(adj):
    """SpGAT only consumes the nonzero *structure* of adj (pyGAT semantics).
    Compute this int8 mask once per graph and reuse it across layers / steps."""
    return (adj != 0).astype(jnp.int8)


def spgat_layer_forward(params, x, adj_nz, mask):
    """adj_nz: (B, N, N) int8/bool nonzero-structure mask (see preprocess_adjacency)."""
    W = params["W"]               # (H, Fin, Fh)
    a_src = params["a_src"]       # (H, 1, Fh)
    a_dst = params["a_dst"]       # (H, 1, Fh)
    W_out = params["W_out"]       # (H*Fh, C)
    a2_src = params["a_out_src"]  # (1, C)
    a2_dst = params["a_out_dst"]  # (1, C)

    H, Fin, Fh = W.shape
    C = W_out.shape[1]
    B, N, _ = x.shape
    assert 2 * H <= 128, "score block layout assumes 2*nheads <= 128"

    Fp = _round_up(Fh, 128)       # per-head padded width -> 128-aligned head slices
    HFp = H * Fp
    Cp = _round_up(C, 128)        # lane-dense output store
    f32 = jnp.float32

    # ---- stage-1 fused weight: head-major padded W blocks + folded attention vectors --
    W_pad = jnp.zeros((H, Fin, Fp), f32).at[:, :, :Fh].set(W)
    W_all = jnp.transpose(W_pad, (1, 0, 2)).reshape(Fin, HFp)
    wa_src = jnp.einsum('hfk,hk->fh', W, a_src[:, 0, :])               # (Fin, H)
    wa_dst = jnp.einsum('hfk,hk->fh', W, a_dst[:, 0, :])               # (Fin, H)
    s_blk = (jnp.zeros((Fin, 128), f32)
             .at[:, :H].set(wa_src)
             .at[:, H:2 * H].set(wa_dst))
    w1 = jnp.concatenate([W_all, s_blk], axis=1).astype(jnp.bfloat16)  # (Fin, HFp+128)

    # ---- stage-2 fused weight, rows remapped into the padded slab layout ---------------
    W_out_h = W_out.reshape(H, Fh, C)
    W_out_pad = jnp.zeros((H, Fp, C), f32).at[:, :Fh, :].set(W_out_h).reshape(HFp, C)
    W2_main = jnp.zeros((HFp, Cp), f32).at[:, :C].set(W_out_pad)
    s2_blk = (jnp.zeros((HFp, 128), f32)
              .at[:, 0:1].set(W_out_pad @ a2_src.T)
              .at[:, 1:2].set(W_out_pad @ a2_dst.T))
    w2 = jnp.concatenate([W2_main, s2_blk], axis=1).astype(jnp.bfloat16)  # (HFp, Cp+128)

    x_bf = x.astype(jnp.bfloat16)        # bf16 MXU operand + half the x DMA
    mask = mask.astype(f32)

    # Rough per-step VMEM high-water estimate (bytes); raise the scoped limit only when the
    # monolithic (N,N) working set outgrows the default (v6e/v5e, 128 MiB parts).
    # TODO(synk): for large N (and always on v7x, 64 MiB physical) switch to the
    # column-streamed flash-style variant instead of raising this limit.
    vmem_est = (N * N * (2 + 5 * 4)
                + N * (HFp + 128) * 6 + N * HFp * 4
                + N * (Cp + 128) * 12
                + Fin * (HFp + 128) * 2 + HFp * (Cp + 128) * 2)
    cp_kwargs = dict(dimension_semantics=("parallel",))
    if vmem_est > (32 << 20):
        cp_kwargs["vmem_limit_bytes"] = int(min(vmem_est * 1.25, 112 << 20))

    kernel = functools.partial(spgat_fused_kernel, nheads=H, fp=Fp, nclass=C, cp=Cp)
    out_pad = pl.pallas_call(
        kernel,
        out_shape=jax.ShapeDtypeStruct((B, N, Cp), jnp.float32),
        grid=(B,),
        in_specs=[
            pl.BlockSpec((1, N, Fin), lambda b: (b, 0, 0)),        # x (bf16)
            pl.BlockSpec((1, N, N), lambda b: (b, 0, 0)),          # adj structure (int8)
            pl.BlockSpec((1, N, 1), lambda b: (b, 0, 0)),          # mask (f32)
            pl.BlockSpec((Fin, HFp + 128), lambda b: (0, 0)),      # fused stage-1 weights
            pl.BlockSpec((HFp, Cp + 128), lambda b: (0, 0)),       # fused stage-2 weights
        ],
        out_specs=pl.BlockSpec((1, N, Cp), lambda b: (b, 0, 0)),
        scratch_shapes=[pltpu.VMEM((N, HFp), jnp.float32)],        # concat slab (persistent)
        compiler_params=pltpu.CompilerParams(**cp_kwargs),
    )(x_bf, adj_nz, mask, w1, w2)
    return out_pad[..., :C]


# ------------------------------------- param init -------------------------------------
def xavier_normal(key, shape, gain=1.414):
    # torch.nn.init.xavier_normal_ for 2D: std = gain * sqrt(2 / (fan_in + fan_out))
    fan_out, fan_in = shape[0], shape[1]
    std = gain * (2.0 / (fan_in + fan_out)) ** 0.5
    return std * jax.random.normal(key, shape, dtype=jnp.float32)


if __name__ == "__main__":
    B, N = 2, 16
    nfeat, nhid, nclass, nheads = 16, 16, 8, 2
    # dropout=0.1, alpha=0.2 (alpha baked into LEAKY_ALPHA; dropout identity in eval)

    key = jax.random.PRNGKey(0)
    keys = jax.random.split(key, 8)

    x = jax.random.normal(keys[0], (B, N, nfeat), dtype=jnp.float32)
    adj = (jax.random.uniform(keys[1], (B, N, N)) < 0.3).astype(jnp.float32)
    adj = jnp.maximum(adj, jnp.eye(N, dtype=jnp.float32)[None])        # self-loops
    mask = (jax.random.uniform(keys[2], (B, N, 1)) < 0.8).astype(jnp.float32)

    # per-head parameters of the SpGAT_unit attentions
    W = jnp.stack([xavier_normal(k, (nfeat, nhid))
                   for k in jax.random.split(keys[3], nheads)])         # (H, nfeat, nhid)
    a = jnp.stack([xavier_normal(k, (1, 2 * nhid))
                   for k in jax.random.split(keys[4], nheads)])         # (H, 1, 2*nhid)
    a_src, a_dst = a[:, :, :nhid], a[:, :, nhid:]

    # output attention unit (concat=False)
    W_out = xavier_normal(keys[5], (nhid * nheads, nclass))
    a_out = xavier_normal(keys[6], (1, 2 * nclass))

    params = dict(W=W, a_src=a_src, a_dst=a_dst,
                  W_out=W_out,
                  a_out_src=a_out[:, :nclass],
                  a_out_dst=a_out[:, nclass:])

    # adjacency structure mask computed ONCE per graph (hoisted out of the forward)
    adj_nz = preprocess_adjacency(adj)

    fwd = jax.jit(spgat_layer_forward)
    out = jax.block_until_ready(fwd(params, x, adj_nz, mask))

    assert out.shape == (B, N, nclass)
    assert bool(jnp.all(jnp.isfinite(out)))
    # log_softmax sanity: per-node class probabilities sum to 1
    prob_sums = jnp.sum(jnp.exp(out), axis=-1)
    assert bool(jnp.all(jnp.abs(prob_sums - 1.0) < 1e-3))
    print("KERNEL_OK")
</pallas_src>

<mosaic_0001>
module attributes {stable_mosaic.version = 11 : i64} {
  func.func @spgat_fused_kernel(%arg0: i32, %arg1: memref<1x16x16xbf16, #tpu.memory_space<vmem>>, %arg2: memref<1x16x16xi8, #tpu.memory_space<vmem>>, %arg3: memref<1x16x1xf32, #tpu.memory_space<vmem>>, %arg4: memref<16x384xbf16, #tpu.memory_space<vmem>>, %arg5: memref<256x256xbf16, #tpu.memory_space<vmem>>, %arg6: memref<1x16x128xf32, #tpu.memory_space<vmem>>, %arg7: memref<16x256xf32, #tpu.memory_space<vmem>>) attributes {dimension_semantics = [#tpu.dimension_semantics<parallel>], iteration_bounds = array<i64: 2>, scalar_prefetch = 0 : i64, scratch_operands = 1 : i64, tpu.core_type = #tpu.core_type<tc>, window_params = [{transform_indices = @transform_0, window_bounds = array<i64: 1, 16, 16>}, {transform_indices = @transform_1, window_bounds = array<i64: 1, 16, 16>}, {transform_indices = @transform_2, window_bounds = array<i64: 1, 16, 1>}, {pipeline_mode = #tpu.pipeline_mode<synchronous>, transform_indices = @transform_3, window_bounds = array<i64: 16, 384>}, {pipeline_mode = #tpu.pipeline_mode<synchronous>, transform_indices = @transform_4, window_bounds = array<i64: 256, 256>}, {transform_indices = @transform_5, window_bounds = array<i64: 1, 16, 128>}]} {
    %c0 = arith.constant 0 : index
    %c0_0 = arith.constant 0 : index
    %c0_1 = arith.constant 0 : index
    %0 = vector.load %arg1[%c0, %c0_0, %c0_1] : memref<1x16x16xbf16, #tpu.memory_space<vmem>>, vector<1x16x16xbf16>
    %1 = vector.shape_cast %0 : vector<1x16x16xbf16> to vector<16x16xbf16>
    %c0_2 = arith.constant 0 : index
    %c0_3 = arith.constant 0 : index
    %c0_4 = arith.constant 0 : index
    %2 = vector.load %arg2[%c0_2, %c0_3, %c0_4] : memref<1x16x16xi8, #tpu.memory_space<vmem>>, vector<1x16x16xi8>
    %3 = vector.shape_cast %2 : vector<1x16x16xi8> to vector<16x16xi8>
    %c0_i8 = arith.constant 0 : i8
    %4 = vector.broadcast %c0_i8 : i8 to vector<16x16xi8>
    %5 = arith.cmpi ne, %3, %4 : vector<16x16xi8>
    %c0_5 = arith.constant 0 : index
    %c0_6 = arith.constant 0 : index
    %c0_7 = arith.constant 0 : index
    %6 = vector.load %arg3[%c0_5, %c0_6, %c0_7] : memref<1x16x1xf32, #tpu.memory_space<vmem>>, vector<1x16x1xf32>
    %7 = vector.shape_cast %6 : vector<1x16x1xf32> to vector<16x1xf32>
    %c0_8 = arith.constant 0 : index
    %c0_9 = arith.constant 0 : index
    %8 = vector.load %arg4[%c0_8, %c0_9] : memref<16x384xbf16, #tpu.memory_space<vmem>>, vector<16x384xbf16>
    %cst = arith.constant dense<0.000000e+00> : vector<16x384xf32>
    %9 = tpu.matmul %1, %8, %cst {dimension_numbers = #tpu.dot_dimension_numbers<[1], [0], [0], [1], [0, 0, 1, 1], [], []>} : vector<16x16xbf16>, vector<16x384xbf16>, vector<16x384xf32> -> vector<16x384xf32>
    %10 = vector.extract_strided_slice %9 {offsets = [0, 0], sizes = [16, 256], strides = [1, 1]} : vector<16x384xf32> to vector<16x256xf32>
    %11 = arith.truncf %10 : vector<16x256xf32> to vector<16x256xbf16>
    %12 = vector.extract_strided_slice %9 {offsets = [0, 256], sizes = [16, 4], strides = [1, 1]} : vector<16x384xf32> to vector<16x4xf32>
    %13 = tpu.transpose %12, [1, 0] : vector<16x4xf32> -> vector<4x16xf32>
    %14 = vector.extract_strided_slice %12 {offsets = [0, 0], sizes = [16, 1], strides = [1, 1]} : vector<16x4xf32> to vector<16x1xf32>
    %15 = vector.extract_strided_slice %13 {offsets = [2, 0], sizes = [1, 16], strides = [1, 1]} : vector<4x16xf32> to vector<1x16xf32>
    %16 = vector.broadcast %14 : vector<16x1xf32> to vector<16x16xf32>
    %17 = vector.broadcast %15 : vector<1x16xf32> to vector<16x16xf32>
    %18 = arith.addf %16, %17 : vector<16x16xf32>
    %cst_10 = arith.constant 0.000000e+00 : f32
    %19 = vector.broadcast %cst_10 : f32 to vector<16x16xf32>
    %20 = arith.cmpf ogt, %18, %19 : vector<16x16xf32>
    %cst_11 = arith.constant 2.000000e-01 : f32
    %21 = vector.broadcast %cst_11 : f32 to vector<16x16xf32>
    %22 = arith.mulf %21, %18 : vector<16x16xf32>
    %23 = arith.select %20, %18, %22 : vector<16x16xi1>, vector<16x16xf32>
    %cst_12 = arith.constant 0.000000e+00 : f32
    %24 = vector.broadcast %cst_12 : f32 to vector<16x16xf32>
    %25 = arith.subf %24, %23 : vector<16x16xf32>
    %26 = math.exp %25 : vector<16x16xf32>
    %cst_13 = arith.constant 0.000000e+00 : f32
    %27 = vector.broadcast %cst_13 : f32 to vector<16x16xf32>
    %28 = arith.select %5, %26, %27 : vector<16x16xi1>, vector<16x16xf32>
    %cst_14 = arith.constant dense<0.000000e+00> : vector<16xf32>
    %29 = vector.multi_reduction <add>, %28, %cst_14 [1] : vector<16x16xf32> to vector<16xf32>
    %30 = vector.shape_cast %29 : vector<16xf32> to vector<16x1xf32>
    %31 = arith.truncf %28 : vector<16x16xf32> to vector<16x16xbf16>
    %32 = vector.extract_strided_slice %11 {offsets = [0, 0], sizes = [16, 128], strides = [1, 1]} : vector<16x256xbf16> to vector<16x128xbf16>
    %cst_15 = arith.constant dense<0.000000e+00> : vector<16x128xf32>
    %33 = tpu.matmul %31, %32, %cst_15 {dimension_numbers = #tpu.dot_dimension_numbers<[1], [0], [0], [1], [0, 0, 1, 1], [], []>} : vector<16x16xbf16>, vector<16x128xbf16>, vector<16x128xf32> -> vector<16x128xf32>
    %cst_16 = arith.constant 1.000000e-25 : f32
    %34 = vector.broadcast %cst_16 : f32 to vector<16x1xf32>
    %35 = arith.addf %30, %34 : vector<16x1xf32>
    %36 = tpu.reciprocal %35 : vector<16x1xf32> -> vector<16x1xf32>
    %37 = vector.broadcast %36 : vector<16x1xf32> to vector<16x128xf32>
    %38 = arith.mulf %33, %37 : vector<16x128xf32>
    %cst_17 = arith.constant 0.000000e+00 : f32
    %39 = vector.broadcast %cst_17 : f32 to vector<16x128xf32>
    %40 = arith.cmpf ogt, %38, %39 : vector<16x128xf32>
    %41 = math.exp %38 : vector<16x128xf32>
    %cst_18 = arith.constant 1.000000e+00 : f32
    %42 = vector.broadcast %cst_18 : f32 to vector<16x128xf32>
    %43 = arith.subf %41, %42 : vector<16x128xf32>
    %44 = arith.select %40, %38, %43 : vector<16x128xi1>, vector<16x128xf32>
    %c0_19 = arith.constant 0 : index
    %c0_20 = arith.constant 0 : index
    %45 = vector.load %arg7[%c0_19, %c0_20] : memref<16x256xf32, #tpu.memory_space<vmem>>, vector<16x128xf32>
    tpu.vector_store %arg7[%c0_19, %c0_20], %44 {strides = array<i32>} : memref<16x256xf32, #tpu.memory_space<vmem>>, vector<16x128xf32>,
    %46 = vector.extract_strided_slice %12 {offsets = [0, 1], sizes = [16, 1], strides = [1, 1]} : vector<16x4xf32> to vector<16x1xf32>
    %47 = vector.extract_strided_slice %13 {offsets = [3, 0], sizes = [1, 16], strides = [1, 1]} : vector<4x16xf32> to vector<1x16xf32>
    %48 = vector.broadcast %46 : vector<16x1xf32> to vector<16x16xf32>
    %49 = vector.broadcast %47 : vector<1x16xf32> to vector<16x16xf32>
    %50 = arith.addf %48, %49 : vector<16x16xf32>
    %cst_21 = arith.constant 0.000000e+00 : f32
    %51 = vector.broadcast %cst_21 : f32 to vector<16x16xf32>
    %52 = arith.cmpf ogt, %50, %51 : vector<16x16xf32>
    %cst_22 = arith.constant 2.000000e-01 : f32
    %53 = vector.broadcast %cst_22 : f32 to vector<16x16xf32>
    %54 = arith.mulf %53, %50 : vector<16x16xf32>
    %55 = arith.select %52, %50, %54 : vector<16x16xi1>, vector<16x16xf32>
    %cst_23 = arith.constant 0.000000e+00 : f32
    %56 = vector.broadcast %cst_23 : f32 to vector<16x16xf32>
    %57 = arith.subf %56, %55 : vector<16x16xf32>
    %58 = math.exp %57 : vector<16x16xf32>
    %cst_24 = arith.constant 0.000000e+00 : f32
    %59 = vector.broadcast %cst_24 : f32 to vector<16x16xf32>
    %60 = arith.select %5, %58, %59 : vector<16x16xi1>, vector<16x16xf32>
    %cst_25 = arith.constant dense<0.000000e+00> : vector<16xf32>
    %61 = vector.multi_reduction <add>, %60, %cst_25 [1] : vector<16x16xf32> to vector<16xf32>
    %62 = vector.shape_cast %61 : vector<16xf32> to vector<16x1xf32>
    %63 = arith.truncf %60 : vector<16x16xf32> to vector<16x16xbf16>
    %64 = vector.extract_strided_slice %11 {offsets = [0, 128], sizes = [16, 128], strides = [1, 1]} : vector<16x256xbf16> to vector<16x128xbf16>
    %cst_26 = arith.constant dense<0.000000e+00> : vector<16x128xf32>
    %65 = tpu.matmul %63, %64, %cst_26 {dimension_numbers = #tpu.dot_dimension_numbers<[1], [0], [0], [1], [0, 0, 1, 1], [], []>} : vector<16x16xbf16>, vector<16x128xbf16>, vector<16x128xf32> -> vector<16x128xf32>
    %cst_27 = arith.constant 1.000000e-25 : f32
    %66 = vector.broadcast %cst_27 : f32 to vector<16x1xf32>
    %67 = arith.addf %62, %66 : vector<16x1xf32>
    %68 = tpu.reciprocal %67 : vector<16x1xf32> -> vector<16x1xf32>
    %69 = vector.broadcast %68 : vector<16x1xf32> to vector<16x128xf32>
    %70 = arith.mulf %65, %69 : vector<16x128xf32>
    %cst_28 = arith.constant 0.000000e+00 : f32
    %71 = vector.broadcast %cst_28 : f32 to vector<16x128xf32>
    %72 = arith.cmpf ogt, %70, %71 : vector<16x128xf32>
    %73 = math.exp %70 : vector<16x128xf32>
    %cst_29 = arith.constant 1.000000e+00 : f32
    %74 = vector.broadcast %cst_29 : f32 to vector<16x128xf32>
    %75 = arith.subf %73, %74 : vector<16x128xf32>
    %76 = arith.select %72, %70, %75 : vector<16x128xi1>, vector<16x128xf32>
    %c0_30 = arith.constant 0 : index
    %c128 = arith.constant 128 : index
    %77 = vector.load %arg7[%c0_30, %c128] : memref<16x256xf32, #tpu.memory_space<vmem>>, vector<16x128xf32>
    tpu.vector_store %arg7[%c0_30, %c128], %76 {strides = array<i32>} : memref<16x256xf32, #tpu.memory_space<vmem>>, vector<16x128xf32>,
    %c0_31 = arith.constant 0 : index
    %c0_32 = arith.constant 0 : index
    %78 = vector.load %arg7[%c0_31, %c0_32] : memref<16x256xf32, #tpu.memory_space<vmem>>, vector<16x256xf32>
    %79 = vector.broadcast %7 : vector<16x1xf32> to vector<16x256xf32>
    %80 = arith.mulf %79, %78 : vector<16x256xf32>
    %81 = arith.truncf %80 : vector<16x256xf32> to vector<16x256xbf16>
    %c0_33 = arith.constant 0 : index
    %c0_34 = arith.constant 0 : index
    %82 = vector.load %arg5[%c0_33, %c0_34] : memref<256x256xbf16, #tpu.memory_space<vmem>>, vector<256x256xbf16>
    %cst_35 = arith.constant dense<0.000000e+00> : vector<16x256xf32>
    %83 = tpu.matmul %81, %82, %cst_35 {dimension_numbers = #tpu.dot_dimension_numbers<[1], [0], [0], [1], [0, 0, 1, 1], [], []>} : vector<16x256xbf16>, vector<256x256xbf16>, vector<16x256xf32> -> vector<16x256xf32>
    %84 = vector.extract_strided_slice %83 {offsets = [0, 0], sizes = [16, 128], strides = [1, 1]} : vector<16x256xf32> to vector<16x128xf32>
    %85 = arith.truncf %84 : vector<16x128xf32> to vector<16x128xbf16>
    %86 = vector.extract_strided_slice %83 {offsets = [0, 128], sizes = [16, 1], strides = [1, 1]} : vector<16x256xf32> to vector<16x1xf32>
    %87 = vector.extract_strided_slice %83 {offsets = [0, 129], sizes = [16, 1], strides = [1, 1]} : vector<16x256xf32> to vector<16x1xf32>
    %88 = tpu.transpose %87, [1, 0] : vector<16x1xf32> -> vector<1x16xf32>
    %89 = vector.broadcast %86 : vector<16x1xf32> to vector<16x16xf32>
    %90 = vector.broadcast %88 : vector<1x16xf32> to vector<16x16xf32>
    %91 = arith.addf %89, %90 : vector<16x16xf32>
    %cst_36 = arith.constant 0.000000e+00 : f32
    %92 = vector.broadcast %cst_36 : f32 to vector<16x16xf32>
    %93 = arith.cmpf ogt, %91, %92 : vector<16x16xf32>
    %cst_37 = arith.constant 2.000000e-01 : f32
    %94 = vector.broadcast %cst_37 : f32 to vector<16x16xf32>
    %95 = arith.mulf %94, %91 : vector<16x16xf32>
    %96 = arith.select %93, %91, %95 : vector<16x16xi1>, vector<16x16xf32>
    %cst_38 = arith.constant 0.000000e+00 : f32
    %97 = vector.broadcast %cst_38 : f32 to vector<16x16xf32>
    %98 = arith.subf %97, %96 : vector<16x16xf32>
    %99 = math.exp %98 : vector<16x16xf32>
    %cst_39 = arith.constant 0.000000e+00 : f32
    %100 = vector.broadcast %cst_39 : f32 to vector<16x16xf32>
    %101 = arith.select %5, %99, %100 : vector<16x16xi1>, vector<16x16xf32>
    %cst_40 = arith.constant dense<0.000000e+00> : vector<16xf32>
    %102 = vector.multi_reduction <add>, %101, %cst_40 [1] : vector<16x16xf32> to vector<16xf32>
    %103 = vector.shape_cast %102 : vector<16xf32> to vector<16x1xf32>
    %104 = arith.truncf %101 : vector<16x16xf32> to vector<16x16xbf16>
    %cst_41 = arith.constant dense<0.000000e+00> : vector<16x128xf32>
    %105 = tpu.matmul %104, %85, %cst_41 {dimension_numbers = #tpu.dot_dimension_numbers<[1], [0], [0], [1], [0, 0, 1, 1], [], []>} : vector<16x16xbf16>, vector<16x128xbf16>, vector<16x128xf32> -> vector<16x128xf32>
    %cst_42 = arith.constant 1.000000e-25 : f32
    %106 = vector.broadcast %cst_42 : f32 to vector<16x1xf32>
    %107 = arith.addf %103, %106 : vector<16x1xf32>
    %108 = tpu.reciprocal %107 : vector<16x1xf32> -> vector<16x1xf32>
    %109 = vector.broadcast %108 : vector<16x1xf32> to vector<16x128xf32>
    %110 = arith.mulf %105, %109 : vector<16x128xf32>
    %cst_43 = arith.constant 0.000000e+00 : f32
    %111 = vector.broadcast %cst_43 : f32 to vector<16x128xf32>
    %112 = arith.cmpf ogt, %110, %111 : vector<16x128xf32>
    %113 = math.exp %110 : vector<16x128xf32>
    %cst_44 = arith.constant 1.000000e+00 : f32
    %114 = vector.broadcast %cst_44 : f32 to vector<16x128xf32>
    %115 = arith.subf %113, %114 : vector<16x128xf32>
    %116 = arith.select %112, %110, %115 : vector<16x128xi1>, vector<16x128xf32>
    %117 = vector.broadcast %7 : vector<16x1xf32> to vector<16x128xf32>
    %118 = arith.mulf %117, %116 : vector<16x128xf32>
    %119 = tpu.iota {dimensions = array<i32: 1>} : vector<16x128xi32>
    %c8_i32 = arith.constant 8 : i32
    %120 = vector.broadcast %c8_i32 : i32 to vector<16x128xi32>
    %121 = arith.cmpi slt, %119, %120 : vector<16x128xi32>
    %cst_45 = arith.constant 0xFF800000 : f32
    %122 = vector.broadcast %cst_45 : f32 to vector<16x128xf32>
    %123 = arith.select %121, %118, %122 : vector<16x128xi1>, vector<16x128xf32>
    %cst_46 = arith.constant dense<0xFF800000> : vector<16xf32>
    %124 = vector.multi_reduction <maximumf>, %123, %cst_46 [1] : vector<16x128xf32> to vector<16xf32>
    %125 = vector.shape_cast %124 : vector<16xf32> to vector<16x1xf32>
    %126 = vector.broadcast %125 : vector<16x1xf32> to vector<16x128xf32>
    %127 = arith.subf %118, %126 : vector<16x128xf32>
    %128 = math.exp %127 : vector<16x128xf32>
    %cst_47 = arith.constant 0.000000e+00 : f32
    %129 = vector.broadcast %cst_47 : f32 to vector<16x128xf32>
    %130 = arith.select %121, %128, %129 : vector<16x128xi1>, vector<16x128xf32>
    %cst_48 = arith.constant dense<0.000000e+00> : vector<16xf32>
    %131 = vector.multi_reduction <add>, %130, %cst_48 [1] : vector<16x128xf32> to vector<16xf32>
    %132 = vector.shape_cast %131 : vector<16xf32> to vector<16x1xf32>
    %133 = math.log %132 : vector<16x1xf32>
    %134 = vector.broadcast %133 : vector<16x1xf32> to vector<16x128xf32>
    %135 = arith.subf %127, %134 : vector<16x128xf32>
    %c0_49 = arith.constant 0 : index
    %c0_50 = arith.constant 0 : index
    %c0_51 = arith.constant 0 : index
    %136 = vector.load %arg6[%c0_49, %c0_50, %c0_51] : memref<1x16x128xf32, #tpu.memory_space<vmem>>, vector<1x16x128xf32>
    %137 = vector.shape_cast %136 : vector<1x16x128xf32> to vector<16x128xf32>
    %138 = vector.shape_cast %135 : vector<16x128xf32> to vector<1x16x128xf32>
    tpu.vector_store %arg6[%c0_49, %c0_50, %c0_51], %138 {strides = array<i32>} : memref<1x16x128xf32, #tpu.memory_space<vmem>>, vector<1x16x128xf32>,
    return
  }
  func.func @transform_0(%arg0: i32) -> (i32, i32, i32) {
    %c0_i32 = arith.constant 0 : i32
    %c0_i32_0 = arith.constant 0 : i32
    %c0_i32_1 = arith.constant 0 : i32
    return %arg0, %c0_i32, %c0_i32_0 : i32, i32, i32
  }
  func.func @transform_1(%arg0: i32) -> (i32, i32, i32) {
    %c0_i32 = arith.constant 0 : i32
    %c0_i32_0 = arith.constant 0 : i32
    %c0_i32_1 = arith.constant 0 : i32
    return %arg0, %c0_i32, %c0_i32_0 : i32, i32, i32
  }
  func.func @transform_2(%arg0: i32) -> (i32, i32, i32) {
    %c0_i32 = arith.constant 0 : i32
    %c0_i32_0 = arith.constant 0 : i32
    %c0_i32_1 = arith.constant 0 : i32
    return %arg0, %c0_i32, %c0_i32_0 : i32, i32, i32
  }
  func.func @transform_3(%arg0: i32) -> (i32, i32) {
    %c0_i32 = arith.constant 0 : i32
    %c0_i32_0 = arith.constant 0 : i32
    %c0_i32_1 = arith.constant 0 : i32
    return %c0_i32, %c0_i32_0 : i32, i32
  }
  func.func @transform_4(%arg0: i32) -> (i32, i32) {
    %c0_i32 = arith.constant 0 : i32
    %c0_i32_0 = arith.constant 0 : i32
    %c0_i32_1 = arith.constant 0 : i32
    return %c0_i32, %c0_i32_0 : i32, i32
  }
  func.func @transform_5(%arg0: i32) -> (i32, i32, i32) {
    %c0_i32 = arith.constant 0 : i32
    %c0_i32_0 = arith.constant 0 : i32
    %c0_i32_1 = arith.constant 0 : i32
    return %arg0, %c0_i32, %c0_i32_0 : i32, i32, i32
  }
}

</mosaic_0001>

<bundles_post_ra>
// kernel: spgat_layer_forward.1
= control target key start
LH: loop header
LB: loop body
LE: loop exit
PB: predicated region body
PF: predicated region fallthrough
CT: control target
= control target key end

     0   :  { %s1380_s18 = smov 0   ;;  %s1595_s0 = inlined_call_operand.vmem [shape: bf16[2,16,16], index: 0, kind: input, shape index: {}]   ;;  %s1596_s1 = inlined_call_operand.vmem [shape: s8[2,16,16], index: 1, kind: input, shape index: {}]   ;;  %s1597_s2 = inlined_call_operand.vmem [shape: f32[2,16,1], index: 2, kind: input, shape index: {}]   ;;  %s1598_s3 = inlined_call_operand.vmem [shape: bf16[16,384], index: 3, kind: input, shape index: {}]   ;;  %s1599_s4 = inlined_call_operand.vmem [shape: bf16[256,256], index: 4, kind: input, shape index: {}]   ;;  %s1600_s5 = inlined_call_operand.vmem [shape: f32[2,16,128], index: 5, kind: output, shape index: {}]  }
   0x1 LB: > { %s1126_s19 = sadd.s32 4294967295, %s1343_s18   ;;  %p1130_p0 = scmp.ge.s32.totalorder %s1343_s18, 1  ;;  %s1343_s18 = sphi %s1380_s18, %s15_s18  }
   0x2   : > { %p207_p1 = scmp.lt.s32.totalorder %s1343_s18, 3 }
   0x4   : > { %p208_p2 = pnand %p1130_p0, %p207_p1 }
   0x5   : > { %v1240_v0 = vld [vmem:[%s1598_s3 + $0x4] ss:$12 sps:$4 sm:$0xff] (!%p208_p2)   ;;  %v1242_v1 = vld [vmem:[%s1598_s3] ss:$12 sps:$4 sm:$0xff] (!%p208_p2)   ;;  %v1345_v2 = vmov (!%p208_p2), 0   ;;  %p245_p3 = scmp.lt.s32.totalorder (!%p208_p2), %s1126_s19, 1  ;;  %v433_v17 = vlaneseq (!%p208_p2) }
   0x6   : > { %211 = sbr.rel (%p208_p2) target bundleno = 1707 (0x6ab), region = 40  ;;  %337 = vmatprep.mubr.bf16.mxu1 (!%p208_p2), %v1345_v2  ;;  %1237 = vset.pattern.permute.xlu0 (!%p208_p2), %v1345_v2  ;;  %v1346_v3 = vmov (!%p208_p2), 0.0   ;;  %v1244_v4 = vld [vmem:[%s1598_s3 + $0x8] ss:$12 sps:$4 sm:$0xff] (!%p208_p2)   ;;  %vm301_vm0 = vcmask (!%p208_p2), 130048   ;;  %vm1347_vm1 = vmmov (!%p208_p2), 0  }
   0x7   : > { %305 = vmatprep.subr.bf16.mxu1 (!%p208_p2), %v1240_v0  ;;  %v1348_v6 = vmov (!%p208_p2), 1   ;;  %v1422_v19 = vshrl.u32 (!%p208_p2), %v433_v17, 7  ;;  %s1349_s11 = smov (!%p208_p2), 127  }
   0x8   : > { %306 = vmatpush1.bf16.msra.mxu1 (!%p208_p2), %v1242_v1  ;;  %1238 = vset.pattern.permute.xlu1 (!%p208_p2), %v1348_v6 }
   0x9   : > { %1200 = vmatprep.subr.bf16.mxu1 (!%p208_p2), %v1346_v3  ;;  %v435_v22 = vsub.s32 (!%p208_p2), 2, %v1422_v19  ;;  %v538_v23 = vsub.s32 (!%p208_p2), 3, %v1422_v19 }
   0xd   : > { %s1606_s19 = smov (!%p245_p3, %s1126_s19), 1 }
   0xe   : > { %s1188_s26 = sshll.u32 %s1606_s19, 3  ;;  %s1189_s30 = sshll.u32 %s1606_s19, 2 }
   0xf   : > { %s249_s29 = scalar_lea.vmem %s1595_s0, %s1188_s26  ;;  %s254_s8 = scalar_lea.vmem %s1596_s1, %s1189_s30 }
  0x10   : > { %v1243_v5 = vld [vmem:[%s249_s29] sm:$0xff]   ;;  %s1190_s9 = sshll.u32 %s1606_s19, 4 }
  0x11   : > { %1143 = vmatmul.mubr.msk.bf16.vlgmr.msra.gmra.mrb[0].mxu1 %vm301_vm0, %v1243_v5  ;;  %v270_v38 = vld [vmem:[%s254_s8] sm:$0x3]  ;;  %v271_v43 = vld [vmem:[%s254_s8 + $0x2] sm:$0x3]  ;;  %s259_s12 = scalar_lea.vmem %s1597_s2, %s1190_s9  ;;  %s264_s14 = scalar_lea.vmem %s1600_s5, %s1190_s9 }
  0x12   : > { %1201 = vmatpush3.bf16.msra.mxu1 %v1244_v4  ;;  %1202 = vmatprep.mubr.msk.bf16.mxu1 %vm1347_vm1, %v1346_v3  ;;  %vm272_vm6 = vnez %v270_v38  ;;  %vm273_vm7 = vnez %v271_v43  ;;  %v1287_v38 = vld [vmem:[%s1599_s4 + $0xe4] ss:$8 sps:$4 sm:$0xff]  }
  0x13   : > { %1206 = vmatprep.subr.bf16.mxu1 %v1346_v3  ;;  %v451_v50 = vsel %vm272_vm6, 16843009, %v1345_v2  ;;  %v452_v51 = vsel %vm273_vm7, 16843009, %v1345_v2 }
  0x14   : > { %v453_v52 = vunpack.c.0.s8 %v451_v50  ;;  %v454_v53 = vunpack.c.0.s8 %v452_v51 }
  0x16   : > { %vm1432_vm8 = vcmp.ne.s32.totalorder %v453_v52, 0  ;;  %vm1436_vm9 = vcmp.ne.s32.totalorder %v454_v53, 0 }
  0x19   : > { %1203 = vmatmul.mubr.msk.bf16.vlgmr.msra.gmra.mrb[4].mxu1 %vm301_vm0, %v1243_v5 }
  0x1a   : > { %1208 = vmatprep.mubr.msk.bf16.mxu1 %vm1347_vm1, %v1346_v3 }
  0xe4   : > { %v339_v7 = vpop.f32.mrb[0].mxu1 }
  0xe5   : > { %v1413_v8 = vpop.f32.mrb[1].mxu1 }
  0xe6   : > { %v343_v9 = vpop.f32.mrb[2].mxu1 }
  0xe7   : > { %v389_v10 = vpack.c.bf16 %v343_v9, %v339_v7  ;;  %v1415_v11 = vpop.f32.mrb[3].mxu1  ;;  %v274_v7 = vld [vmem:[%s259_s12] sm:$0xff] }
  0xe8   : > { %v390_v12 = vpack.c.bf16 %v1415_v11, %v1413_v8  ;;  %v1245_v8 = vld [vmem:[%s1599_s4 + $0x4] ss:$8 sps:$4 sm:$0xff]   ;;  %v1247_v9 = vld [vmem:[%s1599_s4] ss:$8 sps:$4 sm:$0xff]   ;;  %v1250_v11 = vld [vmem:[%s1599_s4 + $0x10] ss:$8 sps:$4 sm:$0xff]  }
  0xe9   : > { %1207 = vmatpush3.bf16.msra.mxu1 %v389_v10  ;;  %v1248_v10 = vld [vmem:[%s1599_s4 + $0x14] ss:$8 sps:$4 sm:$0xff]   ;;  %837 = vmatprep.subr.bf16.mxu0 %v1245_v8 }
  0xea   : > { %1212 = vmatprep.subr.bf16.mxu1 %v1346_v3  ;;  %838 = vmatpush1.bf16.msra.mxu0 %v1247_v9 }
  0xeb   : > { %839 = vmatprep.subr.bf16.mxu0 %v1248_v10 }
  0xec   : > { %v382_v13 = vpop.f32.mrb[4].mxu1 }
  0xed   : > { %529 = vperm.xlu1 %1238, %v382_v13   ;;  %425 = vperm.xlu0 %1237, %v382_v13   ;;  %v1204_v14 = vpop.f32.mrb[5].mxu1 }
  0xee   : > { %v385_v15 = vpop.f32.mrb[6].mxu1  ;;  %840 = vmatpush1.bf16.msra.mxu0 %v1250_v11  ;;  %v1254_v14 = vld [vmem:[%s1599_s4 + $0x34] ss:$8 sps:$4 sm:$0xff]  }
  0xef   : > { %v1205_v16 = vpop.f32.mrb[7].mxu1 }
  0xf0   : > { %v1257_v16 = vld [vmem:[%s1599_s4 + $0x44] ss:$8 sps:$4 sm:$0xff]  }
  0xf1   : > { %533 = vperm.xlu1 %1238, %v385_v15   ;;  %430 = vperm.xlu0 %1237, %v385_v15  }
  0xf5   : > { %1239 = vset.pattern.permute.xlu1 %v1345_v2 }
 0x10f   : > { %391 = vxpose.xlu0.b32.start [1/2] (short) (narrow) %v382_v13, 8  ;;  %v1253_v13 = vld [vmem:[%s1599_s4 + $0x20] ss:$8 sps:$4 sm:$0xff]  }
 0x113   : > { %392 = vxpose.xlu0.b32.end [2/2] (short) (narrow) %v385_v15, 8  ;;  %v1256_v15 = vld [vmem:[%s1599_s4 + $0x30] ss:$8 sps:$4 sm:$0xff]  }
 0x16c   : > { %v426_v18 = vpop.permute.xlu0 %425  ;;  %v530_v20 = vpop.permute.xlu1 %529 }
 0x170   : > { %v431_v21 = vpop.permute.xlu0 %430  ;;  %v534_v27 = vpop.permute.xlu1 %533 }
 0x18f   : > { %v407_v24 = vpop.trf.xlu0 }
 0x190   : > { %v436_v25 = vrot.slane %v407_v24, %v435_v22  ;;  %v539_v26 = vrot.slane %v407_v24, %v538_v23  ;;  %v1263_v22 = vld [vmem:[%s1599_s4 + $0x64] ss:$8 sps:$4 sm:$0xff]   ;;  %v1265_v23 = vld [vmem:[%s1599_s4 + $0x60] ss:$8 sps:$4 sm:$0xff]   ;;  %v1266_v24 = vld [vmem:[%s1599_s4 + $0x74] ss:$8 sps:$4 sm:$0xff]  }
 0x192   : > { %v437_v28 = vadd.f32 %v436_v25, %v426_v18  ;;  %v438_v29 = vadd.f32 %v436_v25, %v431_v21  ;;  %v540_v30 = vadd.f32 %v539_v26, %v530_v20  ;;  %v541_v31 = vadd.f32 %v539_v26, %v534_v27  ;;  %v1259_v18 = vld [vmem:[%s1599_s4 + $0x40] ss:$8 sps:$4 sm:$0xff]   ;;  %v1260_v20 = vld [vmem:[%s1599_s4 + $0x54] ss:$8 sps:$4 sm:$0xff]   ;;  %v1262_v21 = vld [vmem:[%s1599_s4 + $0x50] ss:$8 sps:$4 sm:$0xff]  }
 0x193   : > { %v1268_v25 = vld [vmem:[%s1599_s4 + $0x70] ss:$8 sps:$4 sm:$0xff]   ;;  %v1269_v26 = vld [vmem:[%s1599_s4 + $0x84] ss:$8 sps:$4 sm:$0xff]   ;;  %v1271_v27 = vld [vmem:[%s1599_s4 + $0x80] ss:$8 sps:$4 sm:$0xff]  }
 0x194   : > { %vm439_vm2 = vcmp.gt.f32.partialorder %v437_v28, 0.0  ;;  %vm440_vm3 = vcmp.gt.f32.partialorder %v438_v29, 0.0  ;;  %v441_v32 = vmul.f32 0.2, %v437_v28  ;;  %v442_v33 = vmul.f32 0.2, %v438_v29 }
 0x195   : > { %vm542_vm4 = vcmp.gt.f32.partialorder %v540_v30, 0.0  ;;  %vm543_vm5 = vcmp.gt.f32.partialorder %v541_v31, 0.0  ;;  %v544_v34 = vmul.f32 0.2, %v540_v30  ;;  %v545_v35 = vmul.f32 0.2, %v541_v31 }
 0x196   : > { %v443_v36 = vsel %vm439_vm2, %v437_v28, %v441_v32  ;;  %v444_v37 = vsel %vm440_vm3, %v438_v29, %v442_v33  ;;  %v1272_v28 = vld [vmem:[%s1599_s4 + $0x94] ss:$8 sps:$4 sm:$0xff]   ;;  %v1274_v29 = vld [vmem:[%s1599_s4 + $0x90] ss:$8 sps:$4 sm:$0xff]  }
 0x197   : > { %v445_v39 = vsub.f32 0.0, %v443_v36  ;;  %v446_v40 = vsub.f32 0.0, %v444_v37  ;;  %v546_v41 = vsel %vm542_vm4, %v540_v30, %v544_v34  ;;  %v547_v42 = vsel %vm543_vm5, %v541_v31, %v545_v35  ;;  %v1275_v30 = vld [vmem:[%s1599_s4 + $0xa4] ss:$8 sps:$4 sm:$0xff]   ;;  %v1277_v31 = vld [vmem:[%s1599_s4 + $0xa0] ss:$8 sps:$4 sm:$0xff]  }
 0x198   : > { %v548_v44 = vsub.f32 0.0, %v546_v41  ;;  %v549_v45 = vsub.f32 0.0, %v547_v42  ;;  %v1278_v32 = vld [vmem:[%s1599_s4 + $0xb4] ss:$8 sps:$4 sm:$0xff]   ;;  %v1280_v33 = vld [vmem:[%s1599_s4 + $0xb0] ss:$8 sps:$4 sm:$0xff]  }
 0x199   : > { %v447_v46 = vmul.f32 1.442695, %v445_v39  ;;  %v449_v47 = vmul.f32 1.442695, %v446_v40  ;;  %v1281_v34 = vld [vmem:[%s1599_s4 + $0xc4] ss:$8 sps:$4 sm:$0xff]  }
 0x19a   : > { %v550_v48 = vmul.f32 1.442695, %v548_v44  ;;  %v552_v49 = vmul.f32 1.442695, %v549_v45  ;;  %v1283_v35 = vld [vmem:[%s1599_s4 + $0xc0] ss:$8 sps:$4 sm:$0xff]  }
 0x19b   : > { %1293 = vpow2.f32 %v447_v46  ;;  %v1284_v36 = vld [vmem:[%s1599_s4 + $0xd4] ss:$8 sps:$4 sm:$0xff]   ;;  %v1286_v37 = vld [vmem:[%s1599_s4 + $0xd0] ss:$8 sps:$4 sm:$0xff]   ;;  %v1289_v39 = vld [vmem:[%s1599_s4 + $0xe0] ss:$8 sps:$4 sm:$0xff]  }
 0x19c   : > { %1295 = vpow2.f32 %v449_v47  ;;  %v1290_v40 = vld [vmem:[%s1599_s4 + $0xf4] ss:$8 sps:$4 sm:$0xff]   ;;  %v1292_v41 = vld [vmem:[%s1599_s4 + $0xf0] ss:$8 sps:$4 sm:$0xff]  }
 0x19d   : > { %1297 = vpow2.f32 %v550_v48 }
 0x19e   : > { %1299 = vpow2.f32 %v552_v49 }
 0x1a5   : > { %v1294_v56 = vpop.eup %1293 }
 0x1a6   : > { %v1296_v57 = vpop.eup %1295  ;;  %v457_v58 = vsel %vm1432_vm8, %v1294_v56, 0.0 }
 0x1a7   : > { %v1298_v59 = vpop.eup %1297  ;;  %v458_v60 = vsel %vm1436_vm9, %v1296_v57, 0.0  ;;  %v459_v4 = vsel %vm301_vm0, %v457_v58, 0.0 }
 0x1a8   : > { %v1300_v61 = vpop.eup %1299  ;;  %v554_v62 = vsel %vm1432_vm8, %v1298_v59, 0.0  ;;  %v465_v63 = vpack.c.bf16 %v458_v60, %v457_v58  ;;  %v462_v6 = vsel %vm301_vm0, %v458_v60, 0.0 }
 0x1a9   : > { %v555_v0 = vsel %vm1436_vm9, %v1300_v61, 0.0  ;;  %v556_v1 = vsel %vm301_vm0, %v554_v62, 0.0 }
 0x1aa   : > { %v559_v2 = vsel %vm301_vm0, %v555_v0, 0.0  ;;  %557 = vadd.xlane.f32.xlu1 %v556_v1  ;;  %1209 = vmatmul.mubr.msk.bf16.vlgmr.msra.gmra.mrb[8].mxu1 %vm301_vm0, %v465_v63  ;;  %v562_v5 = vpack.c.bf16 %v555_v0, %v554_v62 }
 0x1ab   : > { %560 = vadd.xlane.f32.xlu0 %v559_v2  ;;  %1213 = vmatpush3.bf16.msra.mxu1 %v390_v12  ;;  %v1251_v12 = vld [vmem:[%s1599_s4 + $0x24] ss:$8 sps:$4 sm:$0xff]  }
 0x1ac   : > { %1214 = vmatprep.mubr.msk.bf16.mxu1 %vm1347_vm1, %v1346_v3  ;;  %1218 = vmatprep.subr.bf16.mxu1 %v1346_v3 }
 0x1ad   : > { %841 = vmatprep.subr.bf16.mxu0 %v1251_v12 }
 0x1ae   : > { %460 = vadd.xlane.f32.xlu1 %v459_v4  ;;  %842 = vmatpush1.bf16.msra.mxu0 %v1253_v13 }
 0x1af   : > { %843 = vmatprep.subr.bf16.mxu0 %v1254_v14 }
 0x1b2   : > { %463 = vadd.xlane.f32.xlu1 %v462_v6  ;;  %1215 = vmatmul.mubr.msk.bf16.vlgmr.msra.gmra.mrb[12].mxu1 %vm301_vm0, %v562_v5 }
 0x1b3   : > { %1220 = vmatprep.mubr.msk.bf16.mxu1 %vm1347_vm1, %v1346_v3  ;;  %v275_v3 = vld [vmem:[%s259_s12 + $0x8] sm:$0xff]  ;;  %844 = vmatpush1.bf16.msra.mxu0 %v1256_v15 }
 0x1b4   : > { %845 = vmatprep.subr.bf16.mxu0 %v1257_v16 }
 0x1b7   : > { %846 = vmatpush1.bf16.msra.mxu0 %v1259_v18 }
 0x1b8   : > { %847 = vmatprep.subr.bf16.mxu0 %v1260_v20 }
 0x1bb   : > { %848 = vmatpush1.bf16.msra.mxu0 %v1262_v21 }
 0x1bc   : > { %849 = vmatprep.subr.bf16.mxu0 %v1263_v22 }
 0x1bf   : > { %850 = vmatpush1.bf16.msra.mxu0 %v1265_v23 }
 0x1c0   : > { %851 = vmatprep.subr.bf16.mxu0 %v1266_v24 }
 0x1c3   : > { %631 = vperm.xlu1 %1239, %v274_v7   ;;  %852 = vmatpush1.bf16.msra.mxu0 %v1268_v25 }
 0x1c4   : > { %853 = vmatprep.subr.bf16.mxu0 %v1269_v26 }
 0x1c7   : > { %636 = vperm.xlu1 %1239, %v275_v3   ;;  %854 = vmatpush1.bf16.msra.mxu0 %v1271_v27 }
 0x1c8   : > { %855 = vmatprep.subr.bf16.mxu0 %v1272_v28 }
 0x1cb   : > { %856 = vmatpush1.bf16.msra.mxu0 %v1274_v29 }
 0x1cc   : > { %857 = vmatprep.subr.bf16.mxu0 %v1275_v30 }
 0x1cf   : > { %858 = vmatpush1.bf16.msra.mxu0 %v1277_v31 }
 0x1d0   : > { %859 = vmatprep.subr.bf16.mxu0 %v1278_v32 }
 0x1d3   : > { %860 = vmatpush1.bf16.msra.mxu0 %v1280_v33 }
 0x1d4   : > { %861 = vmatprep.subr.bf16.mxu0 %v1281_v34 }
 0x1d7   : > { %862 = vmatpush1.bf16.msra.mxu0 %v1283_v35 }
 0x1d8   : > { %863 = vmatprep.subr.bf16.mxu0 %v1284_v36 }
 0x1db   : > { %864 = vmatpush1.bf16.msra.mxu0 %v1286_v37 }
 0x1dc   : > { %865 = vmatprep.subr.bf16.mxu0 %v1287_v38  ;;  %v931_v38 = vsub.s32 0, %v1422_v19 }
 0x1df   : > { %866 = vmatpush1.bf16.msra.mxu0 %v1289_v39 }
 0x1e0   : > { %867 = vmatprep.subr.bf16.mxu0 %v1290_v40 }
 0x1e3   : > { %868 = vmatpush1.bf16.msra.mxu0 %v1292_v41 }
 0x237   : > { %v558_v42 = vpop.xlane.xlu1 %557 }
 0x238   : > { %v561_v47 = vpop.xlane.xlu0 %560  ;;  %v607_v48 = vadd.f32 1e-25, %v558_v42 }
 0x239   : > { %v608_v49 = vadd.f32 1e-25, %v561_v47 }
 0x23b   : > { %v461_v43 = vpop.xlane.xlu1 %460 }
 0x23c   : > { %v510_v45 = vadd.f32 1e-25, %v461_v43 }
 0x23e   : > { %1301 = vrcp.f32 %v510_v45 }
 0x23f   : > { %v464_v44 = vpop.xlane.xlu1 %463 }
 0x240   : > { %v511_v46 = vadd.f32 1e-25, %v464_v44 }
 0x242   : > { %1303 = vrcp.f32 %v511_v46 }
 0x243   : > { %1305 = vrcp.f32 %v607_v48  ;;  %v1564_v8 = vpop.permute.xlu1 %631 }
 0x244   : > { %1307 = vrcp.f32 %v608_v49 }
 0x247   : > { %v1566_v14 = vpop.permute.xlu1 %636 }
 0x248   : > { %v1302_v50 = vpop.eup %1301 }
 0x24c   : > { %v1304_v56 = vpop.eup %1303 }
 0x24d   : > { %v1306_v62 = vpop.eup %1305 }
 0x24e   : > { %v1308_v2 = vpop.eup %1307 }
 0x27d   : > { %v503_v51 = vpop.f32.mrb[8].mxu1 }
 0x27e   : > { %v514_v52 = vmul.f32 %v1302_v50, %v503_v51  ;;  %v1210_v53 = vpop.f32.mrb[9].mxu1 }
 0x27f   : > { %v506_v57 = vpop.f32.mrb[10].mxu1 }
 0x280   : > { %v518_v58 = vmul.f32 1.442695, %v514_v52  ;;  %v515_v59 = vmul.f32 %v1304_v56, %v506_v57  ;;  %v1211_v60 = vpop.f32.mrb[11].mxu1  ;;  %vm516_vm10 = vcmp.gt.f32.partialorder %v514_v52, 0.0 }
 0x282   : > { %1309 = vpow2.f32 %v518_v58  ;;  %v520_v61 = vmul.f32 1.442695, %v515_v59  ;;  %vm517_vm11 = vcmp.gt.f32.partialorder %v515_v59, 0.0 }
 0x284   : > { %1311 = vpow2.f32 %v520_v61 }
 0x285   : > { %v600_v63 = vpop.f32.mrb[12].mxu1 }
 0x286   : > { %v611_v0 = vmul.f32 %v1306_v62, %v600_v63  ;;  %v1216_v1 = vpop.f32.mrb[13].mxu1 }
 0x287   : > { %v603_v4 = vpop.f32.mrb[14].mxu1 }
 0x288   : > { %v615_v5 = vmul.f32 1.442695, %v611_v0  ;;  %v612_v6 = vmul.f32 %v1308_v2, %v603_v4  ;;  %v1217_v7 = vpop.f32.mrb[15].mxu1  ;;  %vm613_vm12 = vcmp.gt.f32.partialorder %v611_v0, 0.0 }
 0x28a   : > { %1313 = vpow2.f32 %v615_v5  ;;  %v617_v9 = vmul.f32 1.442695, %v612_v6  ;;  %vm614_vm13 = vcmp.gt.f32.partialorder %v612_v6, 0.0 }
 0x28c   : > { %v1310_v10 = vpop.eup %1309  ;;  %1315 = vpow2.f32 %v617_v9 }
 0x28d   : > { %v1146_v3 = vadd.f32 -1.0, %v1310_v10  ;;  %v1019_v10 = vand.u32 127, %v433_v17 }
 0x28e   : > { %v1312_v11 = vpop.eup %1311 }
 0x28f   : > { %v1147_v12 = vadd.f32 -1.0, %v1312_v11  ;;  %v524_v13 = vsel %vm516_vm10, %v514_v52, %v1146_v3  ;;  %vm1020_vm1 = vcmp.lt.s32.totalorder %v1019_v10, 8 }
 0x290   : > { %v639_v16 = vmul.f32 %v1564_v8, %v524_v13 }
 0x291   : > { %v525_v15 = vsel %vm517_vm11, %v515_v59, %v1147_v12 }
 0x292   : > { %v641_v18 = vmul.f32 %v1566_v14, %v525_v15 }
 0x294   : > { %v1314_v20 = vpop.eup %1313  ;;  %v643_v21 = vpack.c.bf16 %v641_v18, %v639_v16 }
 0x295   : > { %v1149_v22 = vadd.f32 -1.0, %v1314_v20 }
 0x296   : > { %v1316_v23 = vpop.eup %1315 }
 0x297   : > { %v1150_v24 = vadd.f32 -1.0, %v1316_v23  ;;  %v621_v25 = vsel %vm613_vm12, %v611_v0, %v1149_v22 }
 0x298   : > { %v640_v27 = vmul.f32 %v1564_v8, %v621_v25 }
 0x299   : > { %v622_v26 = vsel %vm614_vm13, %v612_v6, %v1150_v24 }
 0x29a   : > { %v642_v28 = vmul.f32 %v1566_v14, %v622_v26 }
 0x29c   : > { %v644_v29 = vpack.c.bf16 %v642_v28, %v640_v27 }
 0x29e   : > { %869 = vmatprep.mubr.bf16.mxu0 %v644_v29 }
 0x29f   : > { %870 = vmatmul.mubr.bf16.vlgmr.msra.gmra.mrb[0].mxu0 %v643_v21 }
 0x372   : > { %v871_v30 = vpop.f32.mrb[0].mxu0 }
 0x373   : > { %v873_v31 = vpop.f32.mrb[1].mxu0 }
 0x374   : > { %883 = vrot.lane.b32.xlu1 %v873_v31, %s1349_s11  ;;  %v875_v32 = vpop.f32.mrb[2].mxu0 }
 0x375   : > { %v880_v33 = vpack.c.bf16 %v875_v32, %v871_v30  ;;  %v877_v34 = vpop.f32.mrb[3].mxu0 }
 0x377   : > { %1219 = vmatpush3.bf16.msra.mxu1 %v880_v33 }
 0x378   : > { %885 = vrot.lane.b32.xlu1 %v877_v34, %s1349_s11 }
 0x37c   : > { %922 = vperm.xlu1 %1239, %v873_v31  }
 0x380   : > { %926 = vperm.xlu1 %1239, %v877_v34  }
 0x3e6   : > { %v884_v35 = vpop.permute.xlu1 %883 }
 0x3e7   : > { %889 = vxpose.xlu0.b32.start [1/2] (short) (narrow) %v884_v35, 8 }
 0x3ea   : > { %v886_v36 = vpop.permute.xlu1 %885 }
 0x3eb   : > { %890 = vxpose.xlu0.b32.end [2/2] (short) (narrow) %v886_v36, 8 }
 0x3fb   : > { %v923_v37 = vpop.permute.xlu1 %922 }
 0x3ff   : > { %v927_v41 = vpop.permute.xlu1 %926 }
 0x467   : > { %v905_v39 = vpop.trf.xlu0 }
 0x468   : > { %v932_v40 = vrot.slane %v905_v39, %v931_v38 }
 0x46a   : > { %v933_v42 = vadd.f32 %v932_v40, %v923_v37  ;;  %v934_v43 = vadd.f32 %v932_v40, %v927_v41 }
 0x46c   : > { %vm935_vm14 = vcmp.gt.f32.partialorder %v933_v42, 0.0  ;;  %vm936_vm15 = vcmp.gt.f32.partialorder %v934_v43, 0.0  ;;  %v937_v44 = vmul.f32 0.2, %v933_v42  ;;  %v938_v45 = vmul.f32 0.2, %v934_v43 }
 0x46e   : > { %v939_v46 = vsel %vm935_vm14, %v933_v42, %v937_v44  ;;  %v940_v47 = vsel %vm936_vm15, %v934_v43, %v938_v45 }
 0x46f   : > { %v941_v48 = vsub.f32 0.0, %v939_v46  ;;  %v942_v49 = vsub.f32 0.0, %v940_v47 }
 0x471   : > { %v943_v50 = vmul.f32 1.442695, %v941_v48  ;;  %v945_v51 = vmul.f32 1.442695, %v942_v49 }
 0x473   : > { %1317 = vpow2.f32 %v943_v50 }
 0x474   : > { %1319 = vpow2.f32 %v945_v51 }
 0x47d   : > { %v1318_v52 = vpop.eup %1317 }
 0x47e   : > { %v1320_v53 = vpop.eup %1319  ;;  %v947_v19 = vsel %vm1432_vm8, %v1318_v52, 0.0 }
 0x47f   : > { %v949_v56 = vsel %vm301_vm0, %v947_v19, 0.0  ;;  %v948_v57 = vsel %vm1436_vm9, %v1320_v53, 0.0 }
 0x480   : > { %950 = vadd.xlane.f32.xlu1 %v949_v56  ;;  %v955_v58 = vpack.c.bf16 %v948_v57, %v947_v19  ;;  %v952_v59 = vsel %vm301_vm0, %v948_v57, 0.0 }
 0x482   : > { %1221 = vmatmul.mubr.msk.bf16.vlgmr.msra.gmra.mrb[16].mxu1 %vm301_vm0, %v955_v58 }
 0x484   : > { %953 = vadd.xlane.f32.xlu1 %v952_v59 }
 0x50d   : > { %v951_v60 = vpop.xlane.xlu1 %950 }
 0x50e   : > { %v1000_v62 = vadd.f32 1e-25, %v951_v60 }
 0x510   : > { %1321 = vrcp.f32 %v1000_v62 }
 0x511   : > { %v954_v61 = vpop.xlane.xlu1 %953 }
 0x512   : > { %v1001_v63 = vadd.f32 1e-25, %v954_v61 }
 0x514   : > { %1323 = vrcp.f32 %v1001_v63 }
 0x51a   : > { %v1322_v54 = vpop.eup %1321 }
 0x51e   : > { %v1324_v4 = vpop.eup %1323 }
 0x555   : > { %v993_v0 = vpop.f32.mrb[16].mxu1 }
 0x556   : > { %v1004_v1 = vmul.f32 %v1322_v54, %v993_v0  ;;  %v1222_v2 = vpop.f32.mrb[17].mxu1 }
 0x557   : > { %v996_v55 = vpop.f32.mrb[18].mxu1 }
 0x558   : > { %v1008_v5 = vmul.f32 1.442695, %v1004_v1  ;;  %v1005_v6 = vmul.f32 %v1324_v4, %v996_v55  ;;  %v1223_v7 = vpop.f32.mrb[19].mxu1  ;;  %vm1006_vm0 = vcmp.gt.f32.partialorder %v1004_v1, 0.0 }
 0x55a   : > { %1325 = vpow2.f32 %v1008_v5  ;;  %v1010_v9 = vmul.f32 1.442695, %v1005_v6  ;;  %vm1007_vm2 = vcmp.gt.f32.partialorder %v1005_v6, 0.0 }
 0x55c   : > { %1327 = vpow2.f32 %v1010_v9 }
 0x564   : > { %v1326_v3 = vpop.eup %1325 }
 0x565   : > { %v1184_v11 = vadd.f32 -1.0, %v1326_v3 }
 0x566   : > { %v1328_v12 = vpop.eup %1327 }
 0x567   : > { %v1014_v13 = vsel %vm1006_vm0, %v1004_v1, %v1184_v11  ;;  %v1185_v15 = vadd.f32 -1.0, %v1328_v12 }
 0x568   : > { %v1016_v16 = vmul.f32 %v1014_v13, %v1564_v8 }
 0x569   : > { %v1015_v18 = vsel %vm1007_vm2, %v1005_v6, %v1185_v15 }
 0x56a   : > { %v1021_v20 = vsel %vm1020_vm1, %v1016_v16, -inf  ;;  %v1017_v21 = vmul.f32 %v1015_v18, %v1566_v14 }
 0x56b   : > { %1023 = vmax.xlane.f32.xlu1 %v1021_v20 }
 0x56c   : > { %v1022_v22 = vsel %vm1020_vm1, %v1017_v21, -inf }
 0x56f   : > { %1025 = vmax.xlane.f32.xlu1 %v1022_v22 }
 0x5f8   : > { %v1024_v17 = vpop.xlane.xlu1 %1023 }
 0x5f9   : > { %v1027_v23 = vsub.f32 %v1016_v16, %v1024_v17 }
 0x5fb   : > { %v1029_v24 = vmul.f32 1.442695, %v1027_v23 }
 0x5fc   : > { %v1026_v25 = vpop.xlane.xlu1 %1025 }
 0x5fd   : > { %1329 = vpow2.f32 %v1029_v24  ;;  %v1028_v26 = vsub.f32 %v1017_v21, %v1026_v25 }
 0x5ff   : > { %v1031_v27 = vmul.f32 1.442695, %v1028_v26 }
 0x601   : > { %1331 = vpow2.f32 %v1031_v27 }
 0x607   : > { %v1330_v28 = vpop.eup %1329 }
 0x608   : > { %v1033_v8 = vsel %vm1020_vm1, %v1330_v28, 0.0 }
 0x609   : > { %1035 = vadd.xlane.f32.xlu0 %v1033_v8 }
 0x60b   : > { %v1332_v29 = vpop.eup %1331 }
 0x60c   : > { %v1034_v14 = vsel %vm1020_vm1, %v1332_v29, 0.0 }
 0x60d   : > { %1037 = vadd.xlane.f32.xlu1 %v1034_v14 }
 0x696   : > { %v1036_v30 = vpop.xlane.xlu0 %1035 }
 0x697   : > { %1333 = vlog2.f32 %v1036_v30 }
 0x69a   : > { %v1038_v31 = vpop.xlane.xlu1 %1037 }
 0x69b   : > { %1335 = vlog2.f32 %v1038_v31 }
 0x6a1   : > { %v1334_v32 = vpop.eup %1333 }
 0x6a2   : > { %v1040_v33 = vmul.f32 0.6931472, %v1334_v32 }
 0x6a4   : > { %v1043_v34 = vsub.f32 %v1027_v23, %v1040_v33 }
 0x6a5   : > { %v1336_v35 = vpop.eup %1335 }
 0x6a6   : > { %1045 = vst [vmem:[%s264_s14] sm:$0xff] %v1043_v34  ;;  %v1042_v36 = vmul.f32 0.6931472, %v1336_v35 }
 0x6a8   : > { %v1044_v37 = vsub.f32 %v1028_v26, %v1042_v36 }
 0x6aa   : > { %1046 = vst [vmem:[%s264_s14 + $0x8] sm:$0xff] %v1044_v37 }
 0x6ab PF: > { %s15_s18 = sadd.s32 1, %s1343_s18  }
 0x6ac   : > { %p12_p4 = scmp.ge.s32.totalorder %s15_s18, 4  }
 0x6ae   :  { %14 = sbr.rel (!%p12_p4) target bundleno = 1 (0x1), region = 76 }

</bundles_post_ra>
